<compile_context>
chip_gen: v7x
topology: tpu7x:2x2x1
jax: 0.10.0
libtpu: 0.0.40
codegen_flags: <defaults>
</compile_context>

<pallas_src>
import math

import jax
import jax.numpy as jnp
from jax.experimental import pallas as pl
from jax.experimental.pallas import tpu as pltpu


NUM_BLOCKS = 5   # 4 blocks in fc_layer + 1 block in fc_layer_AU
EPS = 1e-5       # nn.BatchNorm1d default eps
LANE = 128       # TPU lane width
SUBLANE = 8      # f32 sublane tile


def _round_up(x, m):
    return ((x + m - 1) // m) * m


def _mlp_kernel(vec_ref, w_ref, x_ref, out_ref):
    """Fused (BN-folded) MLP chain for one batch tile, uniform (TB, P) shapes.

    vec_ref : (8, P) f32  row 0 = block-0 BN scale, row 1 = block-0 BN shift,
              rows 2..6 = folded per-block biases (zero-padded lanes).
    w_ref   : (NUM_BLOCKS, P, P) bf16  folded, zero-padded weights, (in, out).
    x_ref   : (TB, P) f32     out_ref : (TB, P) f32
    """
    vecs = vec_ref[...]                              # tiny slab, load once

    # Block-0 BatchNorm affine (the only one without a preceding Linear).
    h = x_ref[...] * vecs[0:1, :] + vecs[1:2, :]

    for i in range(NUM_BLOCKS):
        # ReLU (Dropout is identity in eval mode).
        h = jnp.maximum(h, 0.0)
        # Linear with the NEXT block's BN pre-folded into W / b.
        h = jnp.dot(h.astype(jnp.bfloat16), w_ref[i],
                    preferred_element_type=jnp.float32) + vecs[2 + i:3 + i, :]

    out_ref[...] = h.astype(out_ref.dtype)


def multilabel_classifier_forward(x, vec_slab, w_slab, dims, *, max_tile_batch=2048):
    """x: (B, data_shape) f32.  vec_slab/w_slab from fold_and_pack()."""
    dims = tuple(int(d) for d in dims)
    batch, d_in = x.shape
    d_out = dims[-1]
    assert d_in == dims[0]
    P = vec_slab.shape[1]
    assert w_slab.shape == (NUM_BLOCKS, P, P)

    # Batch tile: multiple of 8 (f32 sublane), capped.  If the grid would
    # collapse to a single large step, split in two so both v7x TensorCores
    # get work (no effect on single-TC v5e/v6e, skipped for small batches).
    rb = _round_up(batch, SUBLANE)
    tb = min(max_tile_batch, rb)
    if tb == rb and rb > 32 * SUBLANE:
        tb = _round_up((rb + 1) // 2, SUBLANE)
    padded_b = _round_up(batch, tb)

    # Zero-pad activations to (padded_b, P): lane-dense loads, exact math.
    xp = jnp.zeros((padded_b, P), x.dtype).at[:batch, :d_in].set(x)

    grid = (padded_b // tb,)

    flops = 2 * padded_b * NUM_BLOCKS * P * P
    bytes_accessed = (padded_b * P * 4 * 2                       # x in + out
                      + w_slab.size * w_slab.dtype.itemsize      # bf16 weights
                      + vec_slab.size * 4)

    out = pl.pallas_call(
        _mlp_kernel,
        out_shape=jax.ShapeDtypeStruct((padded_b, P), jnp.float32),
        grid=grid,
        in_specs=[
            # Small-vector slab: full array, VMEM-resident across all steps.
            pl.BlockSpec(vec_slab.shape, lambda i: (0, 0)),
            # Packed bf16 weights: full array, VMEM-resident across all steps.
            pl.BlockSpec(w_slab.shape, lambda i: (0, 0, 0)),
            # Activations: tiled over batch, lane-dense, pipelined.
            pl.BlockSpec((tb, P), lambda i: (i, 0)),
        ],
        out_specs=pl.BlockSpec((tb, P), lambda i: (i, 0)),
        compiler_params=pltpu.CompilerParams(
            dimension_semantics=("parallel",),
        ),
        cost_estimate=pl.CostEstimate(
            flops=flops, transcendentals=0, bytes_accessed=bytes_accessed),
    )(vec_slab, w_slab, xp)

    return out[:batch, :d_out]


def make_raw_params(key, dims):
    """Deterministic BatchNorm1d + Linear params matching the PyTorch module."""
    raw = []
    for i in range(NUM_BLOCKS):
        fin, fout = dims[i], dims[i + 1]
        key, k_g, k_b, k_m, k_v, k_w, k_bi = jax.random.split(key, 7)
        gamma = 1.0 + 0.1 * jax.random.normal(k_g, (fin,), jnp.float32)
        beta = 0.1 * jax.random.normal(k_b, (fin,), jnp.float32)
        run_mean = 0.1 * jax.random.normal(k_m, (fin,), jnp.float32)
        run_var = jax.random.uniform(k_v, (fin,), jnp.float32, 0.5, 1.5)
        # PyTorch Linear default init (roughly): U(-1/sqrt(fin), 1/sqrt(fin))
        bound = 1.0 / math.sqrt(fin)
        w = jax.random.uniform(k_w, (fout, fin), jnp.float32, -bound, bound)
        b = jax.random.uniform(k_bi, (fout,), jnp.float32, -bound, bound)
        raw.append((gamma, beta, run_mean, run_var, w, b))
    return raw


def fold_and_pack(raw, dims):
    """Fold BN_i (i>=1) into Linear_{i-1}, zero-pad everything to P=128k lanes,
    and pack into one (8, P) f32 vector slab + one (NUM_BLOCKS, P, P) bf16
    weight slab (already transposed to (in, out))."""
    dims = tuple(int(d) for d in dims)
    P = _round_up(max(dims), LANE)

    scales, shifts = [], []
    for (gamma, beta, mean, var, _, _) in raw:
        s = gamma / jnp.sqrt(var + EPS)
        scales.append(s)
        shifts.append(beta - mean * s)

    vec = jnp.zeros((SUBLANE, P), jnp.float32)       # 2 + NUM_BLOCKS <= 8 rows
    vec = vec.at[0, : dims[0]].set(scales[0])
    vec = vec.at[1, : dims[0]].set(shifts[0])

    wsl = jnp.zeros((NUM_BLOCKS, P, P), jnp.float32)
    for i, (_, _, _, _, w, b) in enumerate(raw):
        wt = w.T                                     # (fin, fout)
        bb = b
        if i + 1 < NUM_BLOCKS:
            # Fold the NEXT block's BN affine into this Linear's output.
            wt = wt * scales[i + 1][None, :]
            bb = bb * scales[i + 1] + shifts[i + 1]
        wsl = wsl.at[i, : dims[i], : dims[i + 1]].set(wt)
        vec = vec.at[2 + i, : dims[i + 1]].set(bb)

    return vec, wsl.astype(jnp.bfloat16)


def reference_forward(x, raw):
    """Pure-JAX f32 reference using the RAW (unfolded) params — also validates
    the BN-into-Linear folding done in fold_and_pack()."""
    h = x
    for (gamma, beta, mean, var, w, b) in raw:
        s = gamma / jnp.sqrt(var + EPS)
        sh = beta - mean * s
        h = jnp.maximum(h * s + sh, 0.0)             # BN -> ReLU (Dropout = id)
        h = h @ w.T + b                              # Linear
    return h


if __name__ == "__main__":
    # Shapes consistent with the module's constructor:
    #   data_shape=32, fc_hidden_dims=(64, 64, 32, 32), num_AU=12, batch=8
    dims = (32, 64, 64, 32, 32, 12)
    batch = 8

    key = jax.random.PRNGKey(0)
    key, kx = jax.random.split(key)
    x = jax.random.normal(kx, (batch, dims[0]), jnp.float32)

    raw = make_raw_params(key, dims)
    vec_slab, w_slab = fold_and_pack(raw, dims)

    out = multilabel_classifier_forward(x, vec_slab, w_slab, dims)
    out = jax.block_until_ready(out)

    ref = reference_forward(x, raw)
    assert out.shape == (batch, dims[-1])
    # Tolerance relaxed vs. the pure-f32 version: weights are bf16 on the MXU
    # (f32 accumulation), compounding ~1-2% relative error over 5 layers.
    assert jnp.allclose(out, ref, atol=5e-2, rtol=5e-2), "mismatch vs JAX reference"

    print("KERNEL_OK")
</pallas_src>

<mosaic_0001>
module attributes {stable_mosaic.version = 11 : i64} {
  func.func @_mlp_kernel(%arg0: i32, %arg1: memref<8x128xf32, #tpu.memory_space<vmem>>, %arg2: memref<5x128x128xbf16, #tpu.memory_space<vmem>>, %arg3: memref<8x128xf32, #tpu.memory_space<vmem>>, %arg4: memref<8x128xf32, #tpu.memory_space<vmem>>) attributes {dimension_semantics = [#tpu.dimension_semantics<parallel>], iteration_bounds = array<i64: 1>, scalar_prefetch = 0 : i64, scratch_operands = 0 : i64, tpu.core_type = #tpu.core_type<tc>, window_params = [{pipeline_mode = #tpu.pipeline_mode<synchronous>, transform_indices = @transform_0, window_bounds = array<i64: 8, 128>}, {pipeline_mode = #tpu.pipeline_mode<synchronous>, transform_indices = @transform_1, window_bounds = array<i64: 5, 128, 128>}, {transform_indices = @transform_2, window_bounds = array<i64: 8, 128>}, {transform_indices = @transform_3, window_bounds = array<i64: 8, 128>}]} {
    %c0 = arith.constant 0 : index
    %c0_0 = arith.constant 0 : index
    %0 = vector.load %arg1[%c0, %c0_0] : memref<8x128xf32, #tpu.memory_space<vmem>>, vector<8x128xf32>
    %c0_1 = arith.constant 0 : index
    %c0_2 = arith.constant 0 : index
    %1 = vector.load %arg3[%c0_1, %c0_2] : memref<8x128xf32, #tpu.memory_space<vmem>>, vector<8x128xf32>
    %2 = vector.extract_strided_slice %0 {offsets = [0, 0], sizes = [1, 128], strides = [1, 1]} : vector<8x128xf32> to vector<1x128xf32>
    %3 = vector.broadcast %2 : vector<1x128xf32> to vector<8x128xf32>
    %4 = arith.mulf %1, %3 : vector<8x128xf32>
    %5 = vector.extract_strided_slice %0 {offsets = [1, 0], sizes = [1, 128], strides = [1, 1]} : vector<8x128xf32> to vector<1x128xf32>
    %6 = vector.broadcast %5 : vector<1x128xf32> to vector<8x128xf32>
    %7 = arith.addf %4, %6 : vector<8x128xf32>
    %cst = arith.constant 0.000000e+00 : f32
    %8 = vector.broadcast %cst : f32 to vector<8x128xf32>
    %9 = arith.maximumf %7, %8 : vector<8x128xf32>
    %10 = arith.truncf %9 : vector<8x128xf32> to vector<8x128xbf16>
    %c0_3 = arith.constant 0 : index
    %c0_4 = arith.constant 0 : index
    %c0_5 = arith.constant 0 : index
    %11 = vector.load %arg2[%c0_3, %c0_4, %c0_5] : memref<5x128x128xbf16, #tpu.memory_space<vmem>>, vector<1x128x128xbf16>
    %12 = vector.shape_cast %11 : vector<1x128x128xbf16> to vector<128x128xbf16>
    %cst_6 = arith.constant dense<0.000000e+00> : vector<8x128xf32>
    %13 = tpu.matmul %10, %12, %cst_6 {dimension_numbers = #tpu.dot_dimension_numbers<[1], [0], [0], [1], [0, 0, 1, 1], [], []>} : vector<8x128xbf16>, vector<128x128xbf16>, vector<8x128xf32> -> vector<8x128xf32>
    %14 = vector.extract_strided_slice %0 {offsets = [2, 0], sizes = [1, 128], strides = [1, 1]} : vector<8x128xf32> to vector<1x128xf32>
    %15 = vector.broadcast %14 : vector<1x128xf32> to vector<8x128xf32>
    %16 = arith.addf %13, %15 : vector<8x128xf32>
    %cst_7 = arith.constant 0.000000e+00 : f32
    %17 = vector.broadcast %cst_7 : f32 to vector<8x128xf32>
    %18 = arith.maximumf %16, %17 : vector<8x128xf32>
    %19 = arith.truncf %18 : vector<8x128xf32> to vector<8x128xbf16>
    %c1 = arith.constant 1 : index
    %c0_8 = arith.constant 0 : index
    %c0_9 = arith.constant 0 : index
    %20 = vector.load %arg2[%c1, %c0_8, %c0_9] : memref<5x128x128xbf16, #tpu.memory_space<vmem>>, vector<1x128x128xbf16>
    %21 = vector.shape_cast %20 : vector<1x128x128xbf16> to vector<128x128xbf16>
    %cst_10 = arith.constant dense<0.000000e+00> : vector<8x128xf32>
    %22 = tpu.matmul %19, %21, %cst_10 {dimension_numbers = #tpu.dot_dimension_numbers<[1], [0], [0], [1], [0, 0, 1, 1], [], []>} : vector<8x128xbf16>, vector<128x128xbf16>, vector<8x128xf32> -> vector<8x128xf32>
    %23 = vector.extract_strided_slice %0 {offsets = [3, 0], sizes = [1, 128], strides = [1, 1]} : vector<8x128xf32> to vector<1x128xf32>
    %24 = vector.broadcast %23 : vector<1x128xf32> to vector<8x128xf32>
    %25 = arith.addf %22, %24 : vector<8x128xf32>
    %cst_11 = arith.constant 0.000000e+00 : f32
    %26 = vector.broadcast %cst_11 : f32 to vector<8x128xf32>
    %27 = arith.maximumf %25, %26 : vector<8x128xf32>
    %28 = arith.truncf %27 : vector<8x128xf32> to vector<8x128xbf16>
    %c2 = arith.constant 2 : index
    %c0_12 = arith.constant 0 : index
    %c0_13 = arith.constant 0 : index
    %29 = vector.load %arg2[%c2, %c0_12, %c0_13] : memref<5x128x128xbf16, #tpu.memory_space<vmem>>, vector<1x128x128xbf16>
    %30 = vector.shape_cast %29 : vector<1x128x128xbf16> to vector<128x128xbf16>
    %cst_14 = arith.constant dense<0.000000e+00> : vector<8x128xf32>
    %31 = tpu.matmul %28, %30, %cst_14 {dimension_numbers = #tpu.dot_dimension_numbers<[1], [0], [0], [1], [0, 0, 1, 1], [], []>} : vector<8x128xbf16>, vector<128x128xbf16>, vector<8x128xf32> -> vector<8x128xf32>
    %32 = vector.extract_strided_slice %0 {offsets = [4, 0], sizes = [1, 128], strides = [1, 1]} : vector<8x128xf32> to vector<1x128xf32>
    %33 = vector.broadcast %32 : vector<1x128xf32> to vector<8x128xf32>
    %34 = arith.addf %31, %33 : vector<8x128xf32>
    %cst_15 = arith.constant 0.000000e+00 : f32
    %35 = vector.broadcast %cst_15 : f32 to vector<8x128xf32>
    %36 = arith.maximumf %34, %35 : vector<8x128xf32>
    %37 = arith.truncf %36 : vector<8x128xf32> to vector<8x128xbf16>
    %c3 = arith.constant 3 : index
    %c0_16 = arith.constant 0 : index
    %c0_17 = arith.constant 0 : index
    %38 = vector.load %arg2[%c3, %c0_16, %c0_17] : memref<5x128x128xbf16, #tpu.memory_space<vmem>>, vector<1x128x128xbf16>
    %39 = vector.shape_cast %38 : vector<1x128x128xbf16> to vector<128x128xbf16>
    %cst_18 = arith.constant dense<0.000000e+00> : vector<8x128xf32>
    %40 = tpu.matmul %37, %39, %cst_18 {dimension_numbers = #tpu.dot_dimension_numbers<[1], [0], [0], [1], [0, 0, 1, 1], [], []>} : vector<8x128xbf16>, vector<128x128xbf16>, vector<8x128xf32> -> vector<8x128xf32>
    %41 = vector.extract_strided_slice %0 {offsets = [5, 0], sizes = [1, 128], strides = [1, 1]} : vector<8x128xf32> to vector<1x128xf32>
    %42 = vector.broadcast %41 : vector<1x128xf32> to vector<8x128xf32>
    %43 = arith.addf %40, %42 : vector<8x128xf32>
    %cst_19 = arith.constant 0.000000e+00 : f32
    %44 = vector.broadcast %cst_19 : f32 to vector<8x128xf32>
    %45 = arith.maximumf %43, %44 : vector<8x128xf32>
    %46 = arith.truncf %45 : vector<8x128xf32> to vector<8x128xbf16>
    %c4 = arith.constant 4 : index
    %c0_20 = arith.constant 0 : index
    %c0_21 = arith.constant 0 : index
    %47 = vector.load %arg2[%c4, %c0_20, %c0_21] : memref<5x128x128xbf16, #tpu.memory_space<vmem>>, vector<1x128x128xbf16>
    %48 = vector.shape_cast %47 : vector<1x128x128xbf16> to vector<128x128xbf16>
    %cst_22 = arith.constant dense<0.000000e+00> : vector<8x128xf32>
    %49 = tpu.matmul %46, %48, %cst_22 {dimension_numbers = #tpu.dot_dimension_numbers<[1], [0], [0], [1], [0, 0, 1, 1], [], []>} : vector<8x128xbf16>, vector<128x128xbf16>, vector<8x128xf32> -> vector<8x128xf32>
    %50 = vector.extract_strided_slice %0 {offsets = [6, 0], sizes = [1, 128], strides = [1, 1]} : vector<8x128xf32> to vector<1x128xf32>
    %51 = vector.broadcast %50 : vector<1x128xf32> to vector<8x128xf32>
    %52 = arith.addf %49, %51 : vector<8x128xf32>
    %c0_23 = arith.constant 0 : index
    %c0_24 = arith.constant 0 : index
    %53 = vector.load %arg4[%c0_23, %c0_24] : memref<8x128xf32, #tpu.memory_space<vmem>>, vector<8x128xf32>
    tpu.vector_store %arg4[%c0_23, %c0_24], %52 {strides = array<i32>} : memref<8x128xf32, #tpu.memory_space<vmem>>, vector<8x128xf32>,
    return
  }
  func.func @transform_0(%arg0: i32) -> (i32, i32) {
    %c0_i32 = arith.constant 0 : i32
    %c0_i32_0 = arith.constant 0 : i32
    %c0_i32_1 = arith.constant 0 : i32
    return %c0_i32, %c0_i32_0 : i32, i32
  }
  func.func @transform_1(%arg0: i32) -> (i32, i32, i32) {
    %c0_i32 = arith.constant 0 : i32
    %c0_i32_0 = arith.constant 0 : i32
    %c0_i32_1 = arith.constant 0 : i32
    %c0_i32_2 = arith.constant 0 : i32
    return %c0_i32, %c0_i32_0, %c0_i32_1 : i32, i32, i32
  }
  func.func @transform_2(%arg0: i32) -> (i32, i32) {
    %c0_i32 = arith.constant 0 : i32
    %c0_i32_0 = arith.constant 0 : i32
    return %arg0, %c0_i32 : i32, i32
  }
  func.func @transform_3(%arg0: i32) -> (i32, i32) {
    %c0_i32 = arith.constant 0 : i32
    %c0_i32_0 = arith.constant 0 : i32
    return %arg0, %c0_i32 : i32, i32
  }
}

</mosaic_0001>

<bundles_post_ra>
// kernel: tpu_custom_call.1
= control target key start
LH: loop header
LB: loop body
LE: loop exit
PB: predicated region body
PF: predicated region fallthrough
CT: control target
= control target key end

     0   :  { %8 = vsyncpa [#allocation3], 0  ;;  %s1107_s0 = inlined_call_operand.hbm [shape: f32[8,128], index: 0, kind: input, shape index: {}]   ;;  %s1108_s1 = inlined_call_operand.hbm [shape: bf16[5,128,128], index: 1, kind: input, shape index: {}]   ;;  %s1109_s2 = inlined_call_operand.hbm [shape: f32[8,128], index: 2, kind: input, shape index: {}]   ;;  %s1110_s3 = inlined_call_operand.hbm [shape: f32[8,128], index: 3, kind: output, shape index: {}]  }
   0x1   :  { %9 = vsyncpa [#allocation6], 0 }
   0x2   :  { %10 = vsyncpa [#allocation4], 0  ;;  %s963_s12 = smov [#allocation5]   ;;  %s869_s16 = scalar_lea.hbm %s1108_s1, 5120 }
   0x3   :  { %s26_s13 = sshll.u32 %s963_s12, 4  ;;  %p870_p0 = scmp.ne.s32.totalorder %s1108_s1, %s869_s16  ;;  %s27_s13 = int_to_ptr.vmem [resolvable:$true] %s26_s13 }
   0x4   :  { %p873_p1 = scmp.lt.u32.totalorder %s869_s16, %s1108_s1 }
   0x6   :  { %p875_p2 = pnand %p873_p1, %p870_p0 }
   0x8   :  { %878 = shalt.err (!%p875_p2)
}
   0x9   :  { %s879_s21 = scalar_lea.vmem %s27_s13, 5120  ;;  %p884_p4 = scmp.lt.s32.totalorder %s27_s13, %s27_s13 }
   0xa   :  { %p880_p3 = scmp.ne.s32.totalorder %s27_s13, %s879_s21  ;;  %p885_p5 = scmp.lt.s32.totalorder %s879_s21, %s879_s21 }
   0xc   :  { %p886_p6 = por %p885_p5, %p884_p4 }
   0xe   :  { %p887_p7 = pnand %p886_p6, %p880_p3 }
  0x10   :  { %890 = shalt.err (!%p887_p7)
}
  0x11   :  { %s964_s22 = smov 64   ;;  %s965_s23 = smov 4  }
  0x12   :  { %32 = dma.hbm_to_vmem [thread:$0]  %s1108_s1, 5120, %s27_s13, [#allocation6], %s964_s22, %s964_s22, %s965_s23  }
  0x13   :  { %s966_s26 = smov [#allocation2]   ;;  %s967_s28 = smov [#allocation7]  }
  0x14   :  { %s17_s27 = sshll.u32 %s966_s26, 4  ;;  %s39_s29 = sshll.u32 %s967_s28, 4  ;;  %s18_s27 = int_to_ptr.vmem [resolvable:$true] %s17_s27  ;;  %s40_s29 = int_to_ptr.vmem [resolvable:$true] %s39_s29 }
  0x15   :  { %s891_s5 = scalar_lea.hbm %s1107_s0, 128 }
  0x16   :  { %p892_p8 = scmp.ne.s32.totalorder %s1107_s0, %s891_s5  ;;  %p895_p9 = scmp.lt.u32.totalorder %s891_s5, %s1107_s0 }
  0x18   :  { %p897_p10 = pnand %p895_p9, %p892_p8 }
  0x1a   :  { %900 = shalt.err (!%p897_p10)
}
  0x1b   :  { %s901_s1 = scalar_lea.vmem %s18_s27, 128  ;;  %p906_p12 = scmp.lt.s32.totalorder %s18_s27, %s18_s27 }
  0x1c   :  { %p902_p11 = scmp.ne.s32.totalorder %s18_s27, %s901_s1  ;;  %p907_p13 = scmp.lt.s32.totalorder %s901_s1, %s901_s1 }
  0x1e   :  { %p908_p0 = por %p907_p13, %p906_p12 }
  0x20   :  { %p909_p1 = pnand %p908_p0, %p902_p11 }
  0x22   :  { %912 = shalt.err (!%p909_p1)
}
  0x23   :  { %20 = dma.hbm_to_vmem [thread:$0]  %s1107_s0, 128, %s18_s27, [#allocation3]  }
  0x24   :  { %s913_s14 = scalar_lea.hbm %s1109_s2, 128 }
  0x25   :  { %p914_p2 = scmp.ne.s32.totalorder %s1109_s2, %s913_s14  ;;  %p917_p3 = scmp.lt.u32.totalorder %s913_s14, %s1109_s2 }
  0x27   :  { %p919_p4 = pnand %p917_p3, %p914_p2 }
  0x29   :  { %922 = shalt.err (!%p919_p4)
}
  0x2a   :  { %s923_s19 = scalar_lea.vmem %s40_s29, 128  ;;  %p928_p6 = scmp.lt.s32.totalorder %s40_s29, %s40_s29 }
  0x2b   :  { %p924_p5 = scmp.ne.s32.totalorder %s40_s29, %s923_s19  ;;  %p929_p7 = scmp.lt.s32.totalorder %s923_s19, %s923_s19 }
  0x2d   :  { %p930_p8 = por %p929_p7, %p928_p6 }
  0x2f   :  { %p931_p9 = pnand %p930_p8, %p924_p5 }
  0x31   :  { %934 = shalt.err (!%p931_p9)
}
  0x32   :  { %42 = dma.hbm_to_vmem [thread:$0]  %s1109_s2, 128, %s40_s29, [#allocation6]  }
  0x33   :  { %957 = dma.done.wait [#allocation3], 128  }
  0x34   :  { %958 = vsyncadd [#allocation3], 4294967168 }
  0x35   :  { %959 = dma.done.wait [#allocation6], 5248  }
  0x36   :  { %960 = vsyncadd [#allocation6], 4294962048  ;;  %v968_v0 = vmov 0.0   ;;  %vm969_vm0 = vmmov 0   ;;  %v55_v1 = vlaneseq  ;;  %v829_v2 = vld [vmem:[#allocation5] sm:$0xff]   ;;  %v830_v4 = vld [vmem:[#allocation5 + $0x8] sm:$0xff]  }
  0x37   :  { %721 = vmatprep.subr.bf16.mxu0 %v968_v0  ;;  %737 = vmatprep.mubr.msk.bf16.mxu0 %vm969_vm0, %v968_v0  ;;  %v831_v7 = vld [vmem:[#allocation5 + $0x10] sm:$0xff]   ;;  %v1039_v8 = vld [vmem:[#allocation2] sm:$0xff]  ;;  %v54_v9 = vld [vmem:[#allocation7] sm:$0xff]  ;;  %s970_s2 = smov [#allocation8]  }
  0x38   :  { %741 = vmatprep.subr.bf16.mxu1 %v968_v0  ;;  %757 = vmatprep.mubr.msk.bf16.mxu1 %vm969_vm0, %v968_v0  ;;  %v1033_v3 = vshrl.u32 %v55_v1, 7  ;;  %v837_v12 = vld [vmem:[#allocation5 + $0x40] sm:$0xff]   ;;  %v832_v13 = vld [vmem:[#allocation5 + $0x18] sm:$0xff]   ;;  %v838_v15 = vld [vmem:[#allocation5 + $0x48] sm:$0xff]   ;;  %s626_s21 = sshll.u32 %s970_s2, 4  ;;  %s627_s21 = int_to_ptr.vmem [resolvable:$true] %s626_s21 }
  0x39   :  { %722 = vmatpush3.bf16.msra.mxu0 %v829_v2  ;;  %742 = vmatpush3.bf16.msra.mxu1 %v837_v12  ;;  %v833_v17 = vld [vmem:[#allocation5 + $0x20] sm:$0xff]   ;;  %v839_v19 = vld [vmem:[#allocation5 + $0x50] sm:$0xff]   ;;  %v834_v20 = vld [vmem:[#allocation5 + $0x28] sm:$0xff]   ;;  %s935_s22 = scalar_lea.vmem %s627_s21, 128  ;;  %p940_p11 = scmp.lt.s32.totalorder %s627_s21, %s627_s21 }
  0x3a   :  { %723 = vmatprep.subr.bf16.mxu0 %v968_v0  ;;  %v57_v5 = vsub.s32 0, %v1033_v3  ;;  %v62_v6 = vsub.s32 1, %v1033_v3  ;;  %743 = vmatprep.subr.bf16.mxu1 %v968_v0  ;;  %v840_v21 = vld [vmem:[#allocation5 + $0x58] sm:$0xff]   ;;  %v835_v22 = vld [vmem:[#allocation5 + $0x30] sm:$0xff]   ;;  %v841_v23 = vld [vmem:[#allocation5 + $0x60] sm:$0xff]   ;;  %v85_v35 = vsub.s32 2, %v1033_v3  ;;  %p936_p10 = scmp.ne.s32.totalorder %s627_s21, %s935_s22  ;;  %p941_p12 = scmp.lt.s32.totalorder %s935_s22, %s935_s22 }
  0x3b   :  { %v836_v24 = vld [vmem:[#allocation5 + $0x38] sm:$0xff]   ;;  %v842_v25 = vld [vmem:[#allocation5 + $0x68] sm:$0xff]   ;;  %v843_v27 = vld [vmem:[#allocation5 + $0x70] sm:$0xff]   ;;  %v196_v52 = vsub.s32 3, %v1033_v3 }
  0x3c   :  { %v58_v10 = vrot.slane %v1039_v8, %v57_v5  ;;  %v63_v11 = vrot.slane %v1039_v8, %v62_v6  ;;  %v844_v28 = vld [vmem:[#allocation5 + $0x78] sm:$0xff]   ;;  %v845_v29 = vld [vmem:[#allocation5 + $0x80] sm:$0xff]   ;;  %v846_v30 = vld [vmem:[#allocation5 + $0x88] sm:$0xff]   ;;  %v86_v36 = vrot.slane %v1039_v8, %v85_v35  ;;  %p942_p13 = por %p941_p12, %p940_p11 }
  0x3d   :  { %724 = vmatpush3.bf16.msra.mxu0 %v830_v4  ;;  %744 = vmatpush3.bf16.msra.mxu1 %v838_v15  ;;  %v847_v31 = vld [vmem:[#allocation5 + $0x90] sm:$0xff]   ;;  %v848_v32 = vld [vmem:[#allocation5 + $0x98] sm:$0xff]   ;;  %v849_v33 = vld [vmem:[#allocation5 + $0xa0] sm:$0xff]   ;;  %v197_v53 = vrot.slane %v1039_v8, %v196_v52 }
  0x3e   :  { %725 = vmatprep.subr.bf16.mxu0 %v968_v0  ;;  %v59_v14 = vmul.f32 %v58_v10, %v54_v9  ;;  %745 = vmatprep.subr.bf16.mxu1 %v968_v0  ;;  %v850_v34 = vld [vmem:[#allocation5 + $0xa8] sm:$0xff]   ;;  %v851_v44 = vld [vmem:[#allocation5 + $0xb0] sm:$0xff]   ;;  %v852_v45 = vld [vmem:[#allocation5 + $0xb8] sm:$0xff]   ;;  %p943_p0 = pnand %p942_p13, %p936_p10 }
  0x3f   :  { %v853_v46 = vld [vmem:[#allocation5 + $0xc0] sm:$0xff]   ;;  %v854_v47 = vld [vmem:[#allocation5 + $0xc8] sm:$0xff]   ;;  %v855_v48 = vld [vmem:[#allocation5 + $0xd0] sm:$0xff]  }
  0x40   :  { %v64_v16 = vadd.f32 %v63_v11, %v59_v14  ;;  %v856_v49 = vld [vmem:[#allocation5 + $0xd8] sm:$0xff]   ;;  %v857_v50 = vld [vmem:[#allocation5 + $0xe0] sm:$0xff]   ;;  %v858_v51 = vld [vmem:[#allocation5 + $0xe8] sm:$0xff]  }
  0x41   :  { %726 = vmatpush3.bf16.msra.mxu0 %v831_v7  ;;  %746 = vmatpush3.bf16.msra.mxu1 %v839_v19  ;;  %v859_v61 = vld [vmem:[#allocation5 + $0xf0] sm:$0xff]   ;;  %v860_v62 = vld [vmem:[#allocation5 + $0xf8] sm:$0xff]   ;;  %v861_v63 = vld [vmem:[#allocation5 + $0x100] sm:$0xff]   ;;  %v307_v7 = vsub.s32 4, %v1033_v3  ;;  %v418_v19 = vsub.s32 5, %v1033_v3 }
  0x42   :  { %727 = vmatprep.subr.bf16.mxu0 %v968_v0  ;;  %v65_v18 = vmax.f32 %v64_v16, 0.0  ;;  %747 = vmatprep.subr.bf16.mxu1 %v968_v0  ;;  %v862_v1 = vld [vmem:[#allocation5 + $0x108] sm:$0xff]   ;;  %v863_v2 = vld [vmem:[#allocation5 + $0x110] sm:$0xff]   ;;  %v864_v4 = vld [vmem:[#allocation5 + $0x118] sm:$0xff]  }
  0x43   :  { %v865_v5 = vld [vmem:[#allocation5 + $0x120] sm:$0xff]   ;;  %v866_v6 = vld [vmem:[#allocation5 + $0x128] sm:$0xff]   ;;  %v308_v9 = vrot.slane %v1039_v8, %v307_v7 }
  0x44   :  { %v66_v26 = vpack.c.bf16 %v65_v18, %v65_v18  ;;  %v868_v18 = vld [vmem:[#allocation5 + $0x138] sm:$0xff]  }
  0x45   :  { %728 = vmatpush3.bf16.msra.mxu0 %v832_v13  ;;  %748 = vmatpush3.bf16.msra.mxu1 %v840_v21 }
  0x46   :  { %729 = vmatprep.subr.bf16.mxu0 %v968_v0  ;;  %749 = vmatprep.subr.bf16.mxu1 %v968_v0 }
  0x49   :  { %730 = vmatpush3.bf16.msra.mxu0 %v833_v17  ;;  %750 = vmatpush3.bf16.msra.mxu1 %v841_v23  ;;  %v867_v17 = vld [vmem:[#allocation5 + $0x130] sm:$0xff]  }
  0x4a   :  { %731 = vmatprep.subr.bf16.mxu0 %v968_v0  ;;  %751 = vmatprep.subr.bf16.mxu1 %v968_v0 }
  0x4d   :  { %732 = vmatpush3.bf16.msra.mxu0 %v834_v20  ;;  %752 = vmatpush3.bf16.msra.mxu1 %v842_v25  ;;  %v419_v20 = vrot.slane %v1039_v8, %v418_v19 }
  0x4e   :  { %733 = vmatprep.subr.bf16.mxu0 %v968_v0  ;;  %753 = vmatprep.subr.bf16.mxu1 %v968_v0 }
  0x51   :  { %734 = vmatpush3.bf16.msra.mxu0 %v835_v22  ;;  %754 = vmatpush3.bf16.msra.mxu1 %v843_v27 }
  0x52   :  { %735 = vmatprep.subr.bf16.mxu0 %v968_v0  ;;  %755 = vmatprep.subr.bf16.mxu1 %v968_v0 }
  0x55   :  { %736 = vmatpush3.bf16.msra.mxu0 %v836_v24  ;;  %756 = vmatpush3.bf16.msra.mxu1 %v844_v28  ;;  %v529_v28 = vsub.s32 6, %v1033_v3 }
  0x56   :  { %761 = vmatprep.subr.bf16.mxu0 %v968_v0  ;;  %781 = vmatprep.subr.bf16.mxu1 %v968_v0 }
  0x58   :  { %738 = vmatmul.mubr.bf16.vlgmr.msra.gmra.mrb[0].mxu0 %v66_v26 }
  0x59   :  { %777 = vmatprep.mubr.msk.bf16.mxu0 %vm969_vm0, %v968_v0  ;;  %762 = vmatpush3.bf16.msra.mxu0 %v845_v29  ;;  %v530_v29 = vrot.slane %v1039_v8, %v529_v28 }
  0x5a   :  { %763 = vmatprep.subr.bf16.mxu0 %v968_v0 }
  0x5d   :  { %764 = vmatpush3.bf16.msra.mxu0 %v846_v30 }
  0x5e   :  { %765 = vmatprep.subr.bf16.mxu0 %v968_v0 }
  0x61   :  { %766 = vmatpush3.bf16.msra.mxu0 %v847_v31 }
  0x62   :  { %767 = vmatprep.subr.bf16.mxu0 %v968_v0 }
  0x65   :  { %768 = vmatpush3.bf16.msra.mxu0 %v848_v32 }
  0x66   :  { %769 = vmatprep.subr.bf16.mxu0 %v968_v0 }
  0x69   :  { %770 = vmatpush3.bf16.msra.mxu0 %v849_v33 }
  0x6a   :  { %771 = vmatprep.subr.bf16.mxu0 %v968_v0 }
  0x6d   :  { %772 = vmatpush3.bf16.msra.mxu0 %v850_v34 }
  0x6e   :  { %773 = vmatprep.subr.bf16.mxu0 %v968_v0 }
  0x71   :  { %774 = vmatpush3.bf16.msra.mxu0 %v851_v44 }
  0x72   :  { %775 = vmatprep.subr.bf16.mxu0 %v968_v0 }
  0x75   :  { %776 = vmatpush3.bf16.msra.mxu0 %v852_v45 }
  0x76   :  { %801 = vmatprep.subr.bf16.mxu0 %v968_v0 }
 0x12b   :  { %v169_v37 = vpop.f32.mrb[0].mxu0 }
 0x12c   :  { %v170_v38 = vadd.f32 %v169_v37, %v86_v36  ;;  %v739_v39 = vpop.f32.mrb[1].mxu0 }
 0x12d   :  { %v172_v40 = vpop.f32.mrb[2].mxu0 }
 0x12e   :  { %v175_v41 = vmax.f32 %v170_v38, 0.0  ;;  %v740_v42 = vpop.f32.mrb[3].mxu0 }
 0x130   :  { %v176_v43 = vpack.c.bf16 %v175_v41, %v175_v41 }
 0x132   :  { %758 = vmatmul.mubr.bf16.vlgmr.msra.gmra.mrb[0].mxu1 %v176_v43 }
 0x133   :  { %797 = vmatprep.mubr.msk.bf16.mxu1 %vm969_vm0, %v968_v0  ;;  %782 = vmatpush3.bf16.msra.mxu1 %v853_v46 }
 0x134   :  { %783 = vmatprep.subr.bf16.mxu1 %v968_v0 }
 0x137   :  { %784 = vmatpush3.bf16.msra.mxu1 %v854_v47 }
 0x138   :  { %785 = vmatprep.subr.bf16.mxu1 %v968_v0 }
 0x13b   :  { %786 = vmatpush3.bf16.msra.mxu1 %v855_v48 }
 0x13c   :  { %787 = vmatprep.subr.bf16.mxu1 %v968_v0 }
 0x13f   :  { %788 = vmatpush3.bf16.msra.mxu1 %v856_v49 }
 0x140   :  { %789 = vmatprep.subr.bf16.mxu1 %v968_v0 }
 0x143   :  { %790 = vmatpush3.bf16.msra.mxu1 %v857_v50 }
 0x144   :  { %791 = vmatprep.subr.bf16.mxu1 %v968_v0 }
 0x147   :  { %792 = vmatpush3.bf16.msra.mxu1 %v858_v51 }
 0x148   :  { %793 = vmatprep.subr.bf16.mxu1 %v968_v0 }
 0x14b   :  { %794 = vmatpush3.bf16.msra.mxu1 %v859_v61 }
 0x14c   :  { %795 = vmatprep.subr.bf16.mxu1 %v968_v0 }
 0x14f   :  { %796 = vmatpush3.bf16.msra.mxu1 %v860_v62 }
 0x205   :  { %v280_v54 = vpop.f32.mrb[0].mxu1 }
 0x206   :  { %v281_v55 = vadd.f32 %v280_v54, %v197_v53  ;;  %v759_v56 = vpop.f32.mrb[1].mxu1 }
 0x207   :  { %v283_v57 = vpop.f32.mrb[2].mxu1 }
 0x208   :  { %v286_v58 = vmax.f32 %v281_v55, 0.0  ;;  %v760_v59 = vpop.f32.mrb[3].mxu1 }
 0x20a   :  { %v287_v60 = vpack.c.bf16 %v286_v58, %v286_v58 }
 0x20c   :  { %778 = vmatmul.mubr.bf16.vlgmr.msra.gmra.mrb[4].mxu0 %v287_v60 }
 0x20d   :  { %817 = vmatprep.mubr.msk.bf16.mxu0 %vm969_vm0, %v968_v0  ;;  %802 = vmatpush3.bf16.msra.mxu0 %v861_v63 }
 0x20e   :  { %803 = vmatprep.subr.bf16.mxu0 %v968_v0 }
 0x211   :  { %804 = vmatpush3.bf16.msra.mxu0 %v862_v1 }
 0x212   :  { %805 = vmatprep.subr.bf16.mxu0 %v968_v0 }
 0x215   :  { %806 = vmatpush3.bf16.msra.mxu0 %v863_v2 }
 0x216   :  { %807 = vmatprep.subr.bf16.mxu0 %v968_v0 }
 0x219   :  { %808 = vmatpush3.bf16.msra.mxu0 %v864_v4 }
 0x21a   :  { %809 = vmatprep.subr.bf16.mxu0 %v968_v0 }
 0x21d   :  { %810 = vmatpush3.bf16.msra.mxu0 %v865_v5 }
 0x21e   :  { %811 = vmatprep.subr.bf16.mxu0 %v968_v0 }
 0x221   :  { %812 = vmatpush3.bf16.msra.mxu0 %v866_v6 }
 0x222   :  { %813 = vmatprep.subr.bf16.mxu0 %v968_v0 }
 0x225   :  { %814 = vmatpush3.bf16.msra.mxu0 %v867_v17 }
 0x226   :  { %815 = vmatprep.subr.bf16.mxu0 %v968_v0 }
 0x229   :  { %816 = vmatpush3.bf16.msra.mxu0 %v868_v18 }
 0x2df   :  { %v391_v10 = vpop.f32.mrb[4].mxu0 }
 0x2e0   :  { %v392_v11 = vadd.f32 %v391_v10, %v308_v9  ;;  %v779_v12 = vpop.f32.mrb[5].mxu0 }
 0x2e1   :  { %v394_v13 = vpop.f32.mrb[6].mxu0 }
 0x2e2   :  { %v397_v14 = vmax.f32 %v392_v11, 0.0  ;;  %v780_v15 = vpop.f32.mrb[7].mxu0 }
 0x2e4   :  { %v398_v16 = vpack.c.bf16 %v397_v14, %v397_v14 }
 0x2e6   :  { %798 = vmatmul.mubr.bf16.vlgmr.msra.gmra.mrb[4].mxu1 %v398_v16 }
 0x3b9   :  { %v502_v21 = vpop.f32.mrb[4].mxu1 }
 0x3ba   :  { %v503_v22 = vadd.f32 %v502_v21, %v419_v20  ;;  %v799_v23 = vpop.f32.mrb[5].mxu1 }
 0x3bb   :  { %v505_v24 = vpop.f32.mrb[6].mxu1 }
 0x3bc   :  { %v508_v25 = vmax.f32 %v503_v22, 0.0  ;;  %v800_v26 = vpop.f32.mrb[7].mxu1 }
 0x3be   :  { %v509_v27 = vpack.c.bf16 %v508_v25, %v508_v25 }
 0x3c0   :  { %818 = vmatmul.mubr.bf16.vlgmr.msra.gmra.mrb[8].mxu0 %v509_v27 }
 0x493   :  { %v613_v0 = vpop.f32.mrb[8].mxu0 }
 0x494   :  { %v614_v30 = vadd.f32 %v613_v0, %v530_v29  ;;  %v819_v31 = vpop.f32.mrb[9].mxu0 }
 0x495   :  { %v616_v32 = vpop.f32.mrb[10].mxu0 }
 0x496   :  { %619 = vst [vmem:[#allocation8] sm:$0xff] %v614_v30  ;;  %v820_v33 = vpop.f32.mrb[11].mxu0 }
 0x497   :  { %946 = shalt.err (!%p943_p0)
}
 0x498   :  { %s947_s25 = scalar_lea.hbm %s1110_s3, 128 }
 0x499   :  { %p948_p1 = scmp.ne.s32.totalorder %s1110_s3, %s947_s25  ;;  %p951_p2 = scmp.lt.u32.totalorder %s947_s25, %s1110_s3 }
 0x49b   :  { %p953_p3 = pnand %p951_p2, %p948_p1 }
 0x49d   :  { %956 = shalt.err (!%p953_p3)
}
 0x49e   :  { %629 = dma.vmem_to_hbm [thread:$0]  %s627_s21, 128, %s1110_s3, [#allocation4]  }
 0x49f   :  { %961 = dma.done.wait [#allocation4], 128  }
 0x4a0   :  { %962 = vsyncadd [#allocation4], 4294967168 }
 0x4a1   :  { %633 = vsyncpa [#allocation3], 1 }
 0x4a2   :  { %634 = vsyncpa [#allocation6], 1 }
 0x4a3   :  { %635 = vsyncpa [#allocation4], 1 }

</bundles_post_ra>
